<compile_context>
chip_gen: v5e
topology: v5e:2x2
jax: 0.10.0
libtpu: 0.0.40
codegen_flags: <defaults>
</compile_context>

<pallas_src>
import functools
import math

import jax
import jax.numpy as jnp
from jax.experimental import pallas as pl
from jax.experimental.pallas import tpu as pltpu


def mha_kernel(q_ref, k_ref, v_ref,
               wq_ref, bq_ref, wk_ref, bk_ref, wv_ref, bv_ref,
               wo_ref, bo_ref,
               o_ref,
               qp_ref, kp_ref, vp_ref, ctx_ref,
               *, heads, d_k, bt, seq):
    n = bt * seq
    hidden = heads * d_k

    # (bt, S, H) -> (bt*S, H): leading-dim collapse, no lane movement.
    xq = q_ref[...].reshape(n, hidden)
    xk = k_ref[...].reshape(n, hidden)
    xv = v_ref[...].reshape(n, hidden)

    # Full-width projections (output width H): bf16 operands, f32 accumulation,
    # bias added in f32, then downcast once.  The 1/sqrt(d_k) scale is already
    # folded into wq/bq on the host.
    qp_ref[...] = (jnp.dot(xq, wq_ref[...], preferred_element_type=jnp.float32)
                   + bq_ref[...]).astype(jnp.bfloat16)
    kp_ref[...] = (jnp.dot(xk, wk_ref[...], preferred_element_type=jnp.float32)
                   + bk_ref[...]).astype(jnp.bfloat16)
    vp_ref[...] = (jnp.dot(xv, wv_ref[...], preferred_element_type=jnp.float32)
                   + bv_ref[...]).astype(jnp.bfloat16)

    # Per-head attention.  `heads` is a small compile-time constant, so a
    # static Python loop with static lane slices is used; each iteration's
    # (bt, S, S) temporaries die within the iteration.
    for h in range(heads):
        lo = h * d_k
        qh = qp_ref[:, lo:lo + d_k].reshape(bt, seq, d_k)
        kh = kp_ref[:, lo:lo + d_k].reshape(bt, seq, d_k)
        vh = vp_ref[:, lo:lo + d_k].reshape(bt, seq, d_k)

        # Batched QK^T with the contraction on K's last dim (no explicit .T).
        scores = jnp.einsum('bqd,bkd->bqk', qh, kh,
                            preferred_element_type=jnp.float32)   # (bt, S, S)

        # Numerically stable softmax in f32; EUP approx reciprocal for denom.
        m = jnp.max(scores, axis=-1, keepdims=True)
        e = jnp.exp(scores - m)
        denom = jnp.sum(e, axis=-1, keepdims=True)
        p = (e * pl.reciprocal(denom, approx=True)).astype(jnp.bfloat16)
        # TODO(synk): training-mode dropout on attention probs omitted (eval).

        ctx = jnp.einsum('bqk,bkd->bqd', p, vh,
                         preferred_element_type=jnp.float32)      # (bt, S, d_k)

        # Stack this head's context into the lane slot it occupies in the
        # concatenated (N, H) context, so the output projection below runs as
        # a single dot with contraction depth H (not d_k).
        ctx_ref[:, lo:lo + d_k] = ctx.reshape(n, d_k).astype(jnp.bfloat16)

    # Single output projection for all heads; bo folded in, written once.
    out = (jnp.dot(ctx_ref[...], wo_ref[...],
                   preferred_element_type=jnp.float32) + bo_ref[...])
    o_ref[...] = out.reshape(o_ref.shape).astype(o_ref.dtype)


def _physical_vmem_bytes():
    """Per-core physical VMEM; conservative fallback if the query fails."""
    try:
        return int(pltpu.get_tpu_info().vmem_capacity_bytes)
    except Exception:
        return 64 * 1024 * 1024            # v7x per-TC size (worst case)


def _vmem_footprint(bt, S, H, d_k):
    """Rough per-grid-step VMEM byte estimate for batch tile `bt`."""
    bf16, f32 = 2, 4
    n = bt * S
    total = 0
    total += 2 * 3 * n * H * bf16                    # q/k/v blocks, double-buffered
    total += 2 * n * H * f32                         # output block, double-buffered
    total += 2 * (4 * H * H * bf16 + 4 * H * f32)    # resident weights + biases
    total += 4 * n * H * bf16                        # qp/kp/vp/ctx scratch
    total += bt * S * S * (f32 + f32 + bf16)         # scores + exp + probs (one head)
    total += 3 * bt * S * d_k * bf16 + bt * S * d_k * f32   # qh/kh/vh + ctx temporaries
    return total


def _pick_batch_tile(B, S, H, d_k, budget):
    """Largest divisor of B that fits the budget and keeps grid extent >= 2."""
    best = 1
    for bt in range(B, 0, -1):
        if B % bt != 0:
            continue
        if B >= 2 and B // bt < 2:
            continue                                  # keep the parallel axis >= 2
        if _vmem_footprint(bt, S, H, d_k) <= budget:
            best = bt
            break
    return best


def multi_head_attention(q, k, v, params, *, heads, batch_tile=None):
    """q, k, v: (B, S, H) float32. params: dict of (in,out)-layout weights."""
    B, S, H = q.shape
    assert H % heads == 0
    d_k = H // heads

    phys = _physical_vmem_bytes()
    vmem_limit = int(0.85 * phys)                     # leave headroom for compiler scratch
    if batch_tile is None:
        bt = _pick_batch_tile(B, S, H, d_k, vmem_limit // 2)
    else:
        bt = batch_tile
    assert B % bt == 0, "batch must be divisible by batch_tile"

    cdt = jnp.bfloat16
    scale = 1.0 / math.sqrt(d_k)

    # Activations in bf16 (f32 accumulation happens in-kernel).
    qb, kb, vb = (x.astype(cdt) for x in (q, k, v))

    # Host-side weight prep: fold the 1/sqrt(d_k) scale into wq/bq (in f32,
    # before the bf16 downcast).  Weights stay full (H, H) and are loaded once
    # with a constant index_map (resident in VMEM for the whole kernel).
    wq = (params["wq"] * scale).astype(cdt)
    bq = (params["bq"] * scale).astype(jnp.float32)
    wk = params["wk"].astype(cdt)
    bk = params["bk"].astype(jnp.float32)
    wv = params["wv"].astype(cdt)
    bv = params["bv"].astype(jnp.float32)
    wo = params["wo"].astype(cdt)
    bo = params["bo"].astype(jnp.float32)

    x_spec = pl.BlockSpec((bt, S, H), lambda b: (b, 0, 0))
    w_spec = pl.BlockSpec((H, H), lambda b: (0, 0))       # constant -> DMA'd once
    b_spec = pl.BlockSpec((1, H), lambda b: (0, 0))
    out_spec = pl.BlockSpec((bt, S, H), lambda b: (b, 0, 0))

    kernel = functools.partial(mha_kernel, heads=heads, d_k=d_k, bt=bt, seq=S)

    return pl.pallas_call(
        kernel,
        out_shape=jax.ShapeDtypeStruct((B, S, H), q.dtype),
        grid_spec=pltpu.PrefetchScalarGridSpec(
            num_scalar_prefetch=0,
            grid=(B // bt,),
            in_specs=[x_spec, x_spec, x_spec,
                      w_spec, b_spec,
                      w_spec, b_spec,
                      w_spec, b_spec,
                      w_spec, b_spec],
            out_specs=out_spec,
            scratch_shapes=[pltpu.VMEM((bt * S, H), jnp.bfloat16),   # qp
                            pltpu.VMEM((bt * S, H), jnp.bfloat16),   # kp
                            pltpu.VMEM((bt * S, H), jnp.bfloat16),   # vp
                            pltpu.VMEM((bt * S, H), jnp.bfloat16)],  # ctx (stacked heads)
        ),
        compiler_params=pltpu.CompilerParams(
            dimension_semantics=("parallel",),
            vmem_limit_bytes=vmem_limit),
    )(qb, kb, vb, wq, bq, wk, bk, wv, bv, wo, bo)


def init_params(key, hidden):
    """Deterministic init mimicking nn.Linear default (uniform +-1/sqrt(in))."""
    bound = 1.0 / math.sqrt(hidden)
    keys = jax.random.split(key, 8)

    def u(k, shape):
        return jax.random.uniform(k, shape, jnp.float32, -bound, bound)

    # weights stored as (in, out) == PyTorch weight.T
    return {
        "wq": u(keys[0], (hidden, hidden)), "bq": u(keys[1], (1, hidden)),
        "wk": u(keys[2], (hidden, hidden)), "bk": u(keys[3], (1, hidden)),
        "wv": u(keys[4], (hidden, hidden)), "bv": u(keys[5], (1, hidden)),
        "wo": u(keys[6], (hidden, hidden)), "bo": u(keys[7], (1, hidden)),
    }


def reference_mha(q, k, v, params, *, heads):
    """Pure-JAX f32 reference matching the PyTorch forward (mask=None, eval)."""
    B, S, H = q.shape
    d_k = H // heads

    def lin(x, w, b):
        return x @ w + b

    qp = lin(q, params["wq"], params["bq"]).reshape(B, S, heads, d_k).transpose(0, 2, 1, 3)
    kp = lin(k, params["wk"], params["bk"]).reshape(B, S, heads, d_k).transpose(0, 2, 1, 3)
    vp = lin(v, params["wv"], params["bv"]).reshape(B, S, heads, d_k).transpose(0, 2, 1, 3)
    scores = jnp.einsum("bhqd,bhkd->bhqk", qp, kp) / math.sqrt(d_k)
    p = jax.nn.softmax(scores, axis=-1)
    out = jnp.einsum("bhqk,bhkd->bhqd", p, vp)
    concat = out.transpose(0, 2, 1, 3).reshape(B, S, H)
    return lin(concat, params["wo"], params["bo"])


if __name__ == "__main__":
    B, S, H, HEADS = 2, 8, 32, 4

    key = jax.random.PRNGKey(0)
    kq, kk, kv, kp = jax.random.split(key, 4)
    q = jax.random.normal(kq, (B, S, H), jnp.float32)
    k = jax.random.normal(kk, (B, S, H), jnp.float32)
    v = jax.random.normal(kv, (B, S, H), jnp.float32)
    params = init_params(kp, H)

    out = multi_head_attention(q, k, v, params, heads=HEADS)
    out = jax.block_until_ready(out)

    ref = reference_mha(q, k, v, params, heads=HEADS)
    assert out.shape == (B, S, H)
    # bf16 matmul operands (f32 accumulation) => relaxed tolerance vs f32 ref.
    assert jnp.allclose(out, ref, atol=5e-2, rtol=5e-2), "mismatch vs reference"

    print("KERNEL_OK")
</pallas_src>

<mosaic_0001>
module attributes {stable_mosaic.version = 11 : i64} {
  func.func @mha_kernel(%arg0: i32, %arg1: memref<1x8x32xbf16, #tpu.memory_space<vmem>>, %arg2: memref<1x8x32xbf16, #tpu.memory_space<vmem>>, %arg3: memref<1x8x32xbf16, #tpu.memory_space<vmem>>, %arg4: memref<32x32xbf16, #tpu.memory_space<vmem>>, %arg5: memref<1x32xf32, #tpu.memory_space<vmem>>, %arg6: memref<32x32xbf16, #tpu.memory_space<vmem>>, %arg7: memref<1x32xf32, #tpu.memory_space<vmem>>, %arg8: memref<32x32xbf16, #tpu.memory_space<vmem>>, %arg9: memref<1x32xf32, #tpu.memory_space<vmem>>, %arg10: memref<32x32xbf16, #tpu.memory_space<vmem>>, %arg11: memref<1x32xf32, #tpu.memory_space<vmem>>, %arg12: memref<1x8x32xf32, #tpu.memory_space<vmem>>, %arg13: memref<8x32xbf16, #tpu.memory_space<vmem>>, %arg14: memref<8x32xbf16, #tpu.memory_space<vmem>>, %arg15: memref<8x32xbf16, #tpu.memory_space<vmem>>, %arg16: memref<8x32xbf16, #tpu.memory_space<vmem>>) attributes {dimension_semantics = [#tpu.dimension_semantics<parallel>], iteration_bounds = array<i64: 2>, scalar_prefetch = 0 : i64, scratch_operands = 4 : i64, tpu.core_type = #tpu.core_type<tc>, window_params = [{transform_indices = @transform_0, window_bounds = array<i64: 1, 8, 32>}, {transform_indices = @transform_1, window_bounds = array<i64: 1, 8, 32>}, {transform_indices = @transform_2, window_bounds = array<i64: 1, 8, 32>}, {pipeline_mode = #tpu.pipeline_mode<synchronous>, transform_indices = @transform_3, window_bounds = array<i64: 32, 32>}, {pipeline_mode = #tpu.pipeline_mode<synchronous>, transform_indices = @transform_4, window_bounds = array<i64: 1, 32>}, {pipeline_mode = #tpu.pipeline_mode<synchronous>, transform_indices = @transform_5, window_bounds = array<i64: 32, 32>}, {pipeline_mode = #tpu.pipeline_mode<synchronous>, transform_indices = @transform_6, window_bounds = array<i64: 1, 32>}, {pipeline_mode = #tpu.pipeline_mode<synchronous>, transform_indices = @transform_7, window_bounds = array<i64: 32, 32>}, {pipeline_mode = #tpu.pipeline_mode<synchronous>, transform_indices = @transform_8, window_bounds = array<i64: 1, 32>}, {pipeline_mode = #tpu.pipeline_mode<synchronous>, transform_indices = @transform_9, window_bounds = array<i64: 32, 32>}, {pipeline_mode = #tpu.pipeline_mode<synchronous>, transform_indices = @transform_10, window_bounds = array<i64: 1, 32>}, {transform_indices = @transform_11, window_bounds = array<i64: 1, 8, 32>}]} {
    %c0 = arith.constant 0 : index
    %c0_0 = arith.constant 0 : index
    %c0_1 = arith.constant 0 : index
    %0 = vector.load %arg1[%c0, %c0_0, %c0_1] : memref<1x8x32xbf16, #tpu.memory_space<vmem>>, vector<1x8x32xbf16>
    %1 = vector.shape_cast %0 : vector<1x8x32xbf16> to vector<8x32xbf16>
    %c0_2 = arith.constant 0 : index
    %c0_3 = arith.constant 0 : index
    %c0_4 = arith.constant 0 : index
    %2 = vector.load %arg2[%c0_2, %c0_3, %c0_4] : memref<1x8x32xbf16, #tpu.memory_space<vmem>>, vector<1x8x32xbf16>
    %3 = vector.shape_cast %2 : vector<1x8x32xbf16> to vector<8x32xbf16>
    %c0_5 = arith.constant 0 : index
    %c0_6 = arith.constant 0 : index
    %c0_7 = arith.constant 0 : index
    %4 = vector.load %arg3[%c0_5, %c0_6, %c0_7] : memref<1x8x32xbf16, #tpu.memory_space<vmem>>, vector<1x8x32xbf16>
    %5 = vector.shape_cast %4 : vector<1x8x32xbf16> to vector<8x32xbf16>
    %c0_8 = arith.constant 0 : index
    %c0_9 = arith.constant 0 : index
    %6 = vector.load %arg4[%c0_8, %c0_9] : memref<32x32xbf16, #tpu.memory_space<vmem>>, vector<32x32xbf16>
    %cst = arith.constant dense<0.000000e+00> : vector<8x32xf32>
    %7 = tpu.matmul %1, %6, %cst {dimension_numbers = #tpu.dot_dimension_numbers<[1], [0], [0], [1], [0, 0, 1, 1], [], []>} : vector<8x32xbf16>, vector<32x32xbf16>, vector<8x32xf32> -> vector<8x32xf32>
    %c0_10 = arith.constant 0 : index
    %c0_11 = arith.constant 0 : index
    %8 = vector.load %arg5[%c0_10, %c0_11] : memref<1x32xf32, #tpu.memory_space<vmem>>, vector<1x32xf32>
    %9 = vector.broadcast %8 : vector<1x32xf32> to vector<8x32xf32>
    %10 = arith.addf %7, %9 : vector<8x32xf32>
    %11 = arith.truncf %10 : vector<8x32xf32> to vector<8x32xbf16>
    %c0_12 = arith.constant 0 : index
    %c0_13 = arith.constant 0 : index
    %12 = vector.load %arg13[%c0_12, %c0_13] : memref<8x32xbf16, #tpu.memory_space<vmem>>, vector<8x32xbf16>
    tpu.vector_store %arg13[%c0_12, %c0_13], %11 {strides = array<i32>} : memref<8x32xbf16, #tpu.memory_space<vmem>>, vector<8x32xbf16>,
    %c0_14 = arith.constant 0 : index
    %c0_15 = arith.constant 0 : index
    %13 = vector.load %arg6[%c0_14, %c0_15] : memref<32x32xbf16, #tpu.memory_space<vmem>>, vector<32x32xbf16>
    %cst_16 = arith.constant dense<0.000000e+00> : vector<8x32xf32>
    %14 = tpu.matmul %3, %13, %cst_16 {dimension_numbers = #tpu.dot_dimension_numbers<[1], [0], [0], [1], [0, 0, 1, 1], [], []>} : vector<8x32xbf16>, vector<32x32xbf16>, vector<8x32xf32> -> vector<8x32xf32>
    %c0_17 = arith.constant 0 : index
    %c0_18 = arith.constant 0 : index
    %15 = vector.load %arg7[%c0_17, %c0_18] : memref<1x32xf32, #tpu.memory_space<vmem>>, vector<1x32xf32>
    %16 = vector.broadcast %15 : vector<1x32xf32> to vector<8x32xf32>
    %17 = arith.addf %14, %16 : vector<8x32xf32>
    %18 = arith.truncf %17 : vector<8x32xf32> to vector<8x32xbf16>
    %c0_19 = arith.constant 0 : index
    %c0_20 = arith.constant 0 : index
    %19 = vector.load %arg14[%c0_19, %c0_20] : memref<8x32xbf16, #tpu.memory_space<vmem>>, vector<8x32xbf16>
    tpu.vector_store %arg14[%c0_19, %c0_20], %18 {strides = array<i32>} : memref<8x32xbf16, #tpu.memory_space<vmem>>, vector<8x32xbf16>,
    %c0_21 = arith.constant 0 : index
    %c0_22 = arith.constant 0 : index
    %20 = vector.load %arg8[%c0_21, %c0_22] : memref<32x32xbf16, #tpu.memory_space<vmem>>, vector<32x32xbf16>
    %cst_23 = arith.constant dense<0.000000e+00> : vector<8x32xf32>
    %21 = tpu.matmul %5, %20, %cst_23 {dimension_numbers = #tpu.dot_dimension_numbers<[1], [0], [0], [1], [0, 0, 1, 1], [], []>} : vector<8x32xbf16>, vector<32x32xbf16>, vector<8x32xf32> -> vector<8x32xf32>
    %c0_24 = arith.constant 0 : index
    %c0_25 = arith.constant 0 : index
    %22 = vector.load %arg9[%c0_24, %c0_25] : memref<1x32xf32, #tpu.memory_space<vmem>>, vector<1x32xf32>
    %23 = vector.broadcast %22 : vector<1x32xf32> to vector<8x32xf32>
    %24 = arith.addf %21, %23 : vector<8x32xf32>
    %25 = arith.truncf %24 : vector<8x32xf32> to vector<8x32xbf16>
    %c0_26 = arith.constant 0 : index
    %c0_27 = arith.constant 0 : index
    %26 = vector.load %arg15[%c0_26, %c0_27] : memref<8x32xbf16, #tpu.memory_space<vmem>>, vector<8x32xbf16>
    tpu.vector_store %arg15[%c0_26, %c0_27], %25 {strides = array<i32>} : memref<8x32xbf16, #tpu.memory_space<vmem>>, vector<8x32xbf16>,
    %c0_28 = arith.constant 0 : index
    %c0_29 = arith.constant 0 : index
    %27 = vector.load %arg13[%c0_28, %c0_29] : memref<8x32xbf16, #tpu.memory_space<vmem>>, vector<8x8xbf16>
    %28 = vector.shape_cast %27 : vector<8x8xbf16> to vector<1x8x8xbf16>
    %c0_30 = arith.constant 0 : index
    %c0_31 = arith.constant 0 : index
    %29 = vector.load %arg14[%c0_30, %c0_31] : memref<8x32xbf16, #tpu.memory_space<vmem>>, vector<8x8xbf16>
    %30 = vector.shape_cast %29 : vector<8x8xbf16> to vector<1x8x8xbf16>
    %c0_32 = arith.constant 0 : index
    %c0_33 = arith.constant 0 : index
    %31 = vector.load %arg15[%c0_32, %c0_33] : memref<8x32xbf16, #tpu.memory_space<vmem>>, vector<8x8xbf16>
    %32 = vector.shape_cast %31 : vector<8x8xbf16> to vector<1x8x8xbf16>
    "tpu.trace_start"() <{level = 10 : i32, message = "bqd,bkd->bqk"}> : () -> ()
    %cst_34 = arith.constant dense<0.000000e+00> : vector<1x8x8xf32>
    %33 = tpu.matmul %28, %30, %cst_34 {dimension_numbers = #tpu.dot_dimension_numbers<[2], [2], [1], [1], [0, 0, 0, 1, 1, 1], [0], [0]>} : vector<1x8x8xbf16>, vector<1x8x8xbf16>, vector<1x8x8xf32> -> vector<1x8x8xf32>
    "tpu.trace_stop"() : () -> ()
    %cst_35 = arith.constant dense<0xFF800000> : vector<1x8xf32>
    %34 = vector.multi_reduction <maximumf>, %33, %cst_35 [2] : vector<1x8x8xf32> to vector<1x8xf32>
    %35 = vector.shape_cast %34 : vector<1x8xf32> to vector<1x8x1xf32>
    %36 = vector.broadcast %35 : vector<1x8x1xf32> to vector<1x8x8xf32>
    %37 = arith.subf %33, %36 : vector<1x8x8xf32>
    %38 = math.exp %37 : vector<1x8x8xf32>
    %cst_36 = arith.constant dense<0.000000e+00> : vector<1x8xf32>
    %39 = vector.multi_reduction <add>, %38, %cst_36 [2] : vector<1x8x8xf32> to vector<1x8xf32>
    %40 = vector.shape_cast %39 : vector<1x8xf32> to vector<1x8x1xf32>
    %41 = tpu.reciprocal %40 {approx = true} : vector<1x8x1xf32> -> vector<1x8x1xf32>
    %42 = vector.broadcast %41 : vector<1x8x1xf32> to vector<1x8x8xf32>
    %43 = arith.mulf %38, %42 : vector<1x8x8xf32>
    %44 = arith.truncf %43 : vector<1x8x8xf32> to vector<1x8x8xbf16>
    "tpu.trace_start"() <{level = 10 : i32, message = "bqk,bkd->bqd"}> : () -> ()
    %cst_37 = arith.constant dense<0.000000e+00> : vector<1x8x8xf32>
    %45 = tpu.matmul %44, %32, %cst_37 {dimension_numbers = #tpu.dot_dimension_numbers<[2], [1], [1], [2], [0, 0, 0, 1, 1, 2], [0], [0]>} : vector<1x8x8xbf16>, vector<1x8x8xbf16>, vector<1x8x8xf32> -> vector<1x8x8xf32>
    "tpu.trace_stop"() : () -> ()
    %46 = vector.shape_cast %45 : vector<1x8x8xf32> to vector<8x8xf32>
    %47 = arith.truncf %46 : vector<8x8xf32> to vector<8x8xbf16>
    %c0_38 = arith.constant 0 : index
    %c0_39 = arith.constant 0 : index
    %48 = vector.load %arg16[%c0_38, %c0_39] : memref<8x32xbf16, #tpu.memory_space<vmem>>, vector<8x8xbf16>
    tpu.vector_store %arg16[%c0_38, %c0_39], %47 {strides = array<i32>} : memref<8x32xbf16, #tpu.memory_space<vmem>>, vector<8x8xbf16>,
    %c0_40 = arith.constant 0 : index
    %c8 = arith.constant 8 : index
    %49 = vector.load %arg13[%c0_40, %c8] : memref<8x32xbf16, #tpu.memory_space<vmem>>, vector<8x8xbf16>
    %50 = vector.shape_cast %49 : vector<8x8xbf16> to vector<1x8x8xbf16>
    %c0_41 = arith.constant 0 : index
    %c8_42 = arith.constant 8 : index
    %51 = vector.load %arg14[%c0_41, %c8_42] : memref<8x32xbf16, #tpu.memory_space<vmem>>, vector<8x8xbf16>
    %52 = vector.shape_cast %51 : vector<8x8xbf16> to vector<1x8x8xbf16>
    %c0_43 = arith.constant 0 : index
    %c8_44 = arith.constant 8 : index
    %53 = vector.load %arg15[%c0_43, %c8_44] : memref<8x32xbf16, #tpu.memory_space<vmem>>, vector<8x8xbf16>
    %54 = vector.shape_cast %53 : vector<8x8xbf16> to vector<1x8x8xbf16>
    "tpu.trace_start"() <{level = 10 : i32, message = "bqd,bkd->bqk"}> : () -> ()
    %cst_45 = arith.constant dense<0.000000e+00> : vector<1x8x8xf32>
    %55 = tpu.matmul %50, %52, %cst_45 {dimension_numbers = #tpu.dot_dimension_numbers<[2], [2], [1], [1], [0, 0, 0, 1, 1, 1], [0], [0]>} : vector<1x8x8xbf16>, vector<1x8x8xbf16>, vector<1x8x8xf32> -> vector<1x8x8xf32>
    "tpu.trace_stop"() : () -> ()
    %cst_46 = arith.constant dense<0xFF800000> : vector<1x8xf32>
    %56 = vector.multi_reduction <maximumf>, %55, %cst_46 [2] : vector<1x8x8xf32> to vector<1x8xf32>
    %57 = vector.shape_cast %56 : vector<1x8xf32> to vector<1x8x1xf32>
    %58 = vector.broadcast %57 : vector<1x8x1xf32> to vector<1x8x8xf32>
    %59 = arith.subf %55, %58 : vector<1x8x8xf32>
    %60 = math.exp %59 : vector<1x8x8xf32>
    %cst_47 = arith.constant dense<0.000000e+00> : vector<1x8xf32>
    %61 = vector.multi_reduction <add>, %60, %cst_47 [2] : vector<1x8x8xf32> to vector<1x8xf32>
    %62 = vector.shape_cast %61 : vector<1x8xf32> to vector<1x8x1xf32>
    %63 = tpu.reciprocal %62 {approx = true} : vector<1x8x1xf32> -> vector<1x8x1xf32>
    %64 = vector.broadcast %63 : vector<1x8x1xf32> to vector<1x8x8xf32>
    %65 = arith.mulf %60, %64 : vector<1x8x8xf32>
    %66 = arith.truncf %65 : vector<1x8x8xf32> to vector<1x8x8xbf16>
    "tpu.trace_start"() <{level = 10 : i32, message = "bqk,bkd->bqd"}> : () -> ()
    %cst_48 = arith.constant dense<0.000000e+00> : vector<1x8x8xf32>
    %67 = tpu.matmul %66, %54, %cst_48 {dimension_numbers = #tpu.dot_dimension_numbers<[2], [1], [1], [2], [0, 0, 0, 1, 1, 2], [0], [0]>} : vector<1x8x8xbf16>, vector<1x8x8xbf16>, vector<1x8x8xf32> -> vector<1x8x8xf32>
    "tpu.trace_stop"() : () -> ()
    %68 = vector.shape_cast %67 : vector<1x8x8xf32> to vector<8x8xf32>
    %69 = arith.truncf %68 : vector<8x8xf32> to vector<8x8xbf16>
    %c0_49 = arith.constant 0 : index
    %c8_50 = arith.constant 8 : index
    %70 = vector.load %arg16[%c0_49, %c8_50] : memref<8x32xbf16, #tpu.memory_space<vmem>>, vector<8x8xbf16>
    tpu.vector_store %arg16[%c0_49, %c8_50], %69 {strides = array<i32>} : memref<8x32xbf16, #tpu.memory_space<vmem>>, vector<8x8xbf16>,
    %c0_51 = arith.constant 0 : index
    %c16 = arith.constant 16 : index
    %71 = vector.load %arg13[%c0_51, %c16] : memref<8x32xbf16, #tpu.memory_space<vmem>>, vector<8x8xbf16>
    %72 = vector.shape_cast %71 : vector<8x8xbf16> to vector<1x8x8xbf16>
    %c0_52 = arith.constant 0 : index
    %c16_53 = arith.constant 16 : index
    %73 = vector.load %arg14[%c0_52, %c16_53] : memref<8x32xbf16, #tpu.memory_space<vmem>>, vector<8x8xbf16>
    %74 = vector.shape_cast %73 : vector<8x8xbf16> to vector<1x8x8xbf16>
    %c0_54 = arith.constant 0 : index
    %c16_55 = arith.constant 16 : index
    %75 = vector.load %arg15[%c0_54, %c16_55] : memref<8x32xbf16, #tpu.memory_space<vmem>>, vector<8x8xbf16>
    %76 = vector.shape_cast %75 : vector<8x8xbf16> to vector<1x8x8xbf16>
    "tpu.trace_start"() <{level = 10 : i32, message = "bqd,bkd->bqk"}> : () -> ()
    %cst_56 = arith.constant dense<0.000000e+00> : vector<1x8x8xf32>
    %77 = tpu.matmul %72, %74, %cst_56 {dimension_numbers = #tpu.dot_dimension_numbers<[2], [2], [1], [1], [0, 0, 0, 1, 1, 1], [0], [0]>} : vector<1x8x8xbf16>, vector<1x8x8xbf16>, vector<1x8x8xf32> -> vector<1x8x8xf32>
    "tpu.trace_stop"() : () -> ()
    %cst_57 = arith.constant dense<0xFF800000> : vector<1x8xf32>
    %78 = vector.multi_reduction <maximumf>, %77, %cst_57 [2] : vector<1x8x8xf32> to vector<1x8xf32>
    %79 = vector.shape_cast %78 : vector<1x8xf32> to vector<1x8x1xf32>
    %80 = vector.broadcast %79 : vector<1x8x1xf32> to vector<1x8x8xf32>
    %81 = arith.subf %77, %80 : vector<1x8x8xf32>
    %82 = math.exp %81 : vector<1x8x8xf32>
    %cst_58 = arith.constant dense<0.000000e+00> : vector<1x8xf32>
    %83 = vector.multi_reduction <add>, %82, %cst_58 [2] : vector<1x8x8xf32> to vector<1x8xf32>
    %84 = vector.shape_cast %83 : vector<1x8xf32> to vector<1x8x1xf32>
    %85 = tpu.reciprocal %84 {approx = true} : vector<1x8x1xf32> -> vector<1x8x1xf32>
    %86 = vector.broadcast %85 : vector<1x8x1xf32> to vector<1x8x8xf32>
    %87 = arith.mulf %82, %86 : vector<1x8x8xf32>
    %88 = arith.truncf %87 : vector<1x8x8xf32> to vector<1x8x8xbf16>
    "tpu.trace_start"() <{level = 10 : i32, message = "bqk,bkd->bqd"}> : () -> ()
    %cst_59 = arith.constant dense<0.000000e+00> : vector<1x8x8xf32>
    %89 = tpu.matmul %88, %76, %cst_59 {dimension_numbers = #tpu.dot_dimension_numbers<[2], [1], [1], [2], [0, 0, 0, 1, 1, 2], [0], [0]>} : vector<1x8x8xbf16>, vector<1x8x8xbf16>, vector<1x8x8xf32> -> vector<1x8x8xf32>
    "tpu.trace_stop"() : () -> ()
    %90 = vector.shape_cast %89 : vector<1x8x8xf32> to vector<8x8xf32>
    %91 = arith.truncf %90 : vector<8x8xf32> to vector<8x8xbf16>
    %c0_60 = arith.constant 0 : index
    %c16_61 = arith.constant 16 : index
    %92 = vector.load %arg16[%c0_60, %c16_61] : memref<8x32xbf16, #tpu.memory_space<vmem>>, vector<8x8xbf16>
    tpu.vector_store %arg16[%c0_60, %c16_61], %91 {strides = array<i32>} : memref<8x32xbf16, #tpu.memory_space<vmem>>, vector<8x8xbf16>,
    %c0_62 = arith.constant 0 : index
    %c24 = arith.constant 24 : index
    %93 = vector.load %arg13[%c0_62, %c24] : memref<8x32xbf16, #tpu.memory_space<vmem>>, vector<8x8xbf16>
    %94 = vector.shape_cast %93 : vector<8x8xbf16> to vector<1x8x8xbf16>
    %c0_63 = arith.constant 0 : index
    %c24_64 = arith.constant 24 : index
    %95 = vector.load %arg14[%c0_63, %c24_64] : memref<8x32xbf16, #tpu.memory_space<vmem>>, vector<8x8xbf16>
    %96 = vector.shape_cast %95 : vector<8x8xbf16> to vector<1x8x8xbf16>
    %c0_65 = arith.constant 0 : index
    %c24_66 = arith.constant 24 : index
    %97 = vector.load %arg15[%c0_65, %c24_66] : memref<8x32xbf16, #tpu.memory_space<vmem>>, vector<8x8xbf16>
    %98 = vector.shape_cast %97 : vector<8x8xbf16> to vector<1x8x8xbf16>
    "tpu.trace_start"() <{level = 10 : i32, message = "bqd,bkd->bqk"}> : () -> ()
    %cst_67 = arith.constant dense<0.000000e+00> : vector<1x8x8xf32>
    %99 = tpu.matmul %94, %96, %cst_67 {dimension_numbers = #tpu.dot_dimension_numbers<[2], [2], [1], [1], [0, 0, 0, 1, 1, 1], [0], [0]>} : vector<1x8x8xbf16>, vector<1x8x8xbf16>, vector<1x8x8xf32> -> vector<1x8x8xf32>
    "tpu.trace_stop"() : () -> ()
    %cst_68 = arith.constant dense<0xFF800000> : vector<1x8xf32>
    %100 = vector.multi_reduction <maximumf>, %99, %cst_68 [2] : vector<1x8x8xf32> to vector<1x8xf32>
    %101 = vector.shape_cast %100 : vector<1x8xf32> to vector<1x8x1xf32>
    %102 = vector.broadcast %101 : vector<1x8x1xf32> to vector<1x8x8xf32>
    %103 = arith.subf %99, %102 : vector<1x8x8xf32>
    %104 = math.exp %103 : vector<1x8x8xf32>
    %cst_69 = arith.constant dense<0.000000e+00> : vector<1x8xf32>
    %105 = vector.multi_reduction <add>, %104, %cst_69 [2] : vector<1x8x8xf32> to vector<1x8xf32>
    %106 = vector.shape_cast %105 : vector<1x8xf32> to vector<1x8x1xf32>
    %107 = tpu.reciprocal %106 {approx = true} : vector<1x8x1xf32> -> vector<1x8x1xf32>
    %108 = vector.broadcast %107 : vector<1x8x1xf32> to vector<1x8x8xf32>
    %109 = arith.mulf %104, %108 : vector<1x8x8xf32>
    %110 = arith.truncf %109 : vector<1x8x8xf32> to vector<1x8x8xbf16>
    "tpu.trace_start"() <{level = 10 : i32, message = "bqk,bkd->bqd"}> : () -> ()
    %cst_70 = arith.constant dense<0.000000e+00> : vector<1x8x8xf32>
    %111 = tpu.matmul %110, %98, %cst_70 {dimension_numbers = #tpu.dot_dimension_numbers<[2], [1], [1], [2], [0, 0, 0, 1, 1, 2], [0], [0]>} : vector<1x8x8xbf16>, vector<1x8x8xbf16>, vector<1x8x8xf32> -> vector<1x8x8xf32>
    "tpu.trace_stop"() : () -> ()
    %112 = vector.shape_cast %111 : vector<1x8x8xf32> to vector<8x8xf32>
    %113 = arith.truncf %112 : vector<8x8xf32> to vector<8x8xbf16>
    %c0_71 = arith.constant 0 : index
    %c24_72 = arith.constant 24 : index
    %114 = vector.load %arg16[%c0_71, %c24_72] : memref<8x32xbf16, #tpu.memory_space<vmem>>, vector<8x8xbf16>
    tpu.vector_store %arg16[%c0_71, %c24_72], %113 {strides = array<i32>} : memref<8x32xbf16, #tpu.memory_space<vmem>>, vector<8x8xbf16>,
    %c0_73 = arith.constant 0 : index
    %c0_74 = arith.constant 0 : index
    %115 = vector.load %arg16[%c0_73, %c0_74] : memref<8x32xbf16, #tpu.memory_space<vmem>>, vector<8x32xbf16>
    %c0_75 = arith.constant 0 : index
    %c0_76 = arith.constant 0 : index
    %116 = vector.load %arg10[%c0_75, %c0_76] : memref<32x32xbf16, #tpu.memory_space<vmem>>, vector<32x32xbf16>
    %cst_77 = arith.constant dense<0.000000e+00> : vector<8x32xf32>
    %117 = tpu.matmul %115, %116, %cst_77 {dimension_numbers = #tpu.dot_dimension_numbers<[1], [0], [0], [1], [0, 0, 1, 1], [], []>} : vector<8x32xbf16>, vector<32x32xbf16>, vector<8x32xf32> -> vector<8x32xf32>
    %c0_78 = arith.constant 0 : index
    %c0_79 = arith.constant 0 : index
    %118 = vector.load %arg11[%c0_78, %c0_79] : memref<1x32xf32, #tpu.memory_space<vmem>>, vector<1x32xf32>
    %119 = vector.broadcast %118 : vector<1x32xf32> to vector<8x32xf32>
    %120 = arith.addf %117, %119 : vector<8x32xf32>
    %121 = vector.shape_cast %120 : vector<8x32xf32> to vector<1x8x32xf32>
    %c0_80 = arith.constant 0 : index
    %c0_81 = arith.constant 0 : index
    %c0_82 = arith.constant 0 : index
    %122 = vector.load %arg12[%c0_80, %c0_81, %c0_82] : memref<1x8x32xf32, #tpu.memory_space<vmem>>, vector<1x8x32xf32>
    tpu.vector_store %arg12[%c0_80, %c0_81, %c0_82], %121 {strides = array<i32>} : memref<1x8x32xf32, #tpu.memory_space<vmem>>, vector<1x8x32xf32>,
    return
  }
  func.func @transform_0(%arg0: i32) -> (i32, i32, i32) {
    %c0_i32 = arith.constant 0 : i32
    %c0_i32_0 = arith.constant 0 : i32
    %c0_i32_1 = arith.constant 0 : i32
    return %arg0, %c0_i32, %c0_i32_0 : i32, i32, i32
  }
  func.func @transform_1(%arg0: i32) -> (i32, i32, i32) {
    %c0_i32 = arith.constant 0 : i32
    %c0_i32_0 = arith.constant 0 : i32
    %c0_i32_1 = arith.constant 0 : i32
    return %arg0, %c0_i32, %c0_i32_0 : i32, i32, i32
  }
  func.func @transform_2(%arg0: i32) -> (i32, i32, i32) {
    %c0_i32 = arith.constant 0 : i32
    %c0_i32_0 = arith.constant 0 : i32
    %c0_i32_1 = arith.constant 0 : i32
    return %arg0, %c0_i32, %c0_i32_0 : i32, i32, i32
  }
  func.func @transform_3(%arg0: i32) -> (i32, i32) {
    %c0_i32 = arith.constant 0 : i32
    %c0_i32_0 = arith.constant 0 : i32
    %c0_i32_1 = arith.constant 0 : i32
    return %c0_i32, %c0_i32_0 : i32, i32
  }
  func.func @transform_4(%arg0: i32) -> (i32, i32) {
    %c0_i32 = arith.constant 0 : i32
    %c0_i32_0 = arith.constant 0 : i32
    %c0_i32_1 = arith.constant 0 : i32
    return %c0_i32, %c0_i32_0 : i32, i32
  }
  func.func @transform_5(%arg0: i32) -> (i32, i32) {
    %c0_i32 = arith.constant 0 : i32
    %c0_i32_0 = arith.constant 0 : i32
    %c0_i32_1 = arith.constant 0 : i32
    return %c0_i32, %c0_i32_0 : i32, i32
  }
  func.func @transform_6(%arg0: i32) -> (i32, i32) {
    %c0_i32 = arith.constant 0 : i32
    %c0_i32_0 = arith.constant 0 : i32
    %c0_i32_1 = arith.constant 0 : i32
    return %c0_i32, %c0_i32_0 : i32, i32
  }
  func.func @transform_7(%arg0: i32) -> (i32, i32) {
    %c0_i32 = arith.constant 0 : i32
    %c0_i32_0 = arith.constant 0 : i32
    %c0_i32_1 = arith.constant 0 : i32
    return %c0_i32, %c0_i32_0 : i32, i32
  }
  func.func @transform_8(%arg0: i32) -> (i32, i32) {
    %c0_i32 = arith.constant 0 : i32
    %c0_i32_0 = arith.constant 0 : i32
    %c0_i32_1 = arith.constant 0 : i32
    return %c0_i32, %c0_i32_0 : i32, i32
  }
  func.func @transform_9(%arg0: i32) -> (i32, i32) {
    %c0_i32 = arith.constant 0 : i32
    %c0_i32_0 = arith.constant 0 : i32
    %c0_i32_1 = arith.constant 0 : i32
    return %c0_i32, %c0_i32_0 : i32, i32
  }
  func.func @transform_10(%arg0: i32) -> (i32, i32) {
    %c0_i32 = arith.constant 0 : i32
    %c0_i32_0 = arith.constant 0 : i32
    %c0_i32_1 = arith.constant 0 : i32
    return %c0_i32, %c0_i32_0 : i32, i32
  }
  func.func @transform_11(%arg0: i32) -> (i32, i32, i32) {
    %c0_i32 = arith.constant 0 : i32
    %c0_i32_0 = arith.constant 0 : i32
    %c0_i32_1 = arith.constant 0 : i32
    return %arg0, %c0_i32, %c0_i32_0 : i32, i32, i32
  }
}

</mosaic_0001>

<bundles_post_ra>
// kernel: tpu_custom_call.1
= control target key start
LH: loop header
LB: loop body
LE: loop exit
PB: predicated region body
PF: predicated region fallthrough
CT: control target
= control target key end

     0   :  { %s2007_s0 = inlined_call_operand.hbm [shape: bf16[2,8,32], index: 0, kind: input, shape index: {}]   ;;  %s2008_s1 = inlined_call_operand.hbm [shape: bf16[2,8,32], index: 1, kind: input, shape index: {}]   ;;  %s2009_s2 = inlined_call_operand.hbm [shape: bf16[2,8,32], index: 2, kind: input, shape index: {}]   ;;  %s2010_s3 = inlined_call_operand.hbm [shape: bf16[32,32], index: 3, kind: input, shape index: {}]   ;;  %s2011_s4 = inlined_call_operand.vmem [shape: f32[1,32], index: 4, kind: input, shape index: {}]   ;;  %s2012_s5 = inlined_call_operand.hbm [shape: bf16[32,32], index: 5, kind: input, shape index: {}]   ;;  %s2013_s6 = inlined_call_operand.vmem [shape: f32[1,32], index: 6, kind: input, shape index: {}]   ;;  %s2014_s7 = inlined_call_operand.hbm [shape: bf16[32,32], index: 7, kind: input, shape index: {}]   ;;  %s2015_s8 = inlined_call_operand.vmem [shape: f32[1,32], index: 8, kind: input, shape index: {}]   ;;  %s2016_s9 = inlined_call_operand.hbm [shape: bf16[32,32], index: 9, kind: input, shape index: {}]   ;;  %s2017_s10 = inlined_call_operand.vmem [shape: f32[1,32], index: 10, kind: input, shape index: {}]   ;;  %s2018_s11 = inlined_call_operand.hbm [shape: f32[2,8,32], index: 11, kind: output, shape index: {}]  }
   0x1   :  { %2030 = sst [smem:[#allocation29_spill]] %s2008_s1 }
   0x2   :  { %2031 = sst [smem:[#allocation30_spill]] %s2010_s3 }
   0x3   :  { %2032 = sst [smem:[#allocation31_spill]] %s2012_s5 }
   0x4   :  { %2033 = sst [smem:[#allocation32_spill]] %s2014_s7 }
   0x5   :  { %2034 = sst [smem:[#allocation33_spill]] %s2016_s9 }
   0x6   :  { %2035 = sst [smem:[#allocation34_spill]] %s2017_s10 }
   0x7   :  { %16 = vsyncpa [#allocation7], 0 }
   0x8   :  { %18 = vsyncpa [#allocation7 + $0x1], 0 }
   0x9   :  { %19 = vsyncpa [#allocation10], 0 }
   0xa   :  { %21 = vsyncpa [#allocation10 + $0x1], 0 }
   0xb   :  { %22 = vsyncpa [#allocation13], 0 }
   0xc   :  { %23 = vsyncpa [#allocation16], 0 }
   0xd   :  { %24 = vsyncpa [#allocation8], 0 }
   0xe   :  { %26 = vsyncpa [#allocation8 + $0x1], 0  ;;  %s1718_s17 = smov 0   ;;  %s1720_s18 = smov 0  }
   0xf   :  { %s1722_s19 = smov 0   ;;  %s1724_s20 = smov 0  }
  0x10 LB: > { %2036 = sst [smem:[#allocation24_spill]] %s1632_s17  ;;  %s1742_s24 = sadd.s32 4294967295, %s1644_s20   ;;  %s1644_s20 = sphi %s1724_s20, %s2064_s20   ;;  %s1640_s19 = sphi %s1722_s19, %s2068_s19   ;;  %s1636_s18 = sphi %s1720_s18, %s2067_s18   ;;  %s1632_s17 = sphi %s1718_s17, %s2066_s17  }
  0x11   : > { %2037 = sst [smem:[#allocation25_spill]] %s1644_s20  ;;  %p1154_p0 = scmp.ge.s32.totalorder %s1644_s20, 1 }
  0x12   : > { %s2038_s3 = sld [smem:[#allocation30_spill]]  ;;  %p2029_p1 = scmp.eq.s32.totalorder %s1742_s24, 0 }
  0x13   : > { %p309_p2 = scmp.lt.s32.totalorder %s1644_s20, 3  ;;  %s1646_s26 = smov [#allocation12]  }
  0x14   : > { %s322_s27 = sshll.u32 %s1646_s26, 4  ;;  %s2040_s7 = sld [smem:[#allocation32_spill]]  ;;  %s323_s27 = int_to_ptr.vmem [resolvable:$true] %s322_s27 }
  0x15   : > { %p1747_p3 = pnand %p1154_p0, %p309_p2  ;;  %s1647_s13 = smov [#allocation15]  }
  0x16   : > { %s356_s14 = sshll.u32 %s1647_s13, 4  ;;  %s2019_s15 = smov 64   ;;  %s357_s14 = int_to_ptr.vmem [resolvable:$true] %s356_s14 }
  0x17   : > { %p1255_p4 = pneg %p1747_p3  ;;  %s2021_s16 = smov 4  }
  0x18   : > { %s320_s23 = sshll.u32 %s2038_s3, 4  ;;  %s1153_s21 = sadd.s32 4294967294, %s1644_s20   ;;  %s321_s23 = int_to_ptr.hbm [resolvable:$true] %s320_s23 }
  0x19   : > { %p1759_p6 = pnand %p1255_p4, %p2029_p1  ;;  %s1775_s22 = sadd.s32 1, %s1644_s20  }
  0x1a   : > { %s354_s30 = sshll.u32 %s2040_s7, 4  ;;  %2042 = sst [smem:[#allocation26_spill]] %s1775_s22  ;;  %s355_s30 = int_to_ptr.hbm [resolvable:$true] %s354_s30 }
  0x1b   : > { %1258 = dma.hbm_to_vmem [thread:$0]  (!%p1759_p6), %s321_s23, 256, %s323_s27, [#allocation13], %s2019_s15, %s2019_s15, %s2021_s16  }
  0x1c   : > { %1264 = dma.hbm_to_vmem [thread:$0]  (!%p1759_p6), %s355_s30, 256, %s357_s14, [#allocation16], %s2019_s15, %s2019_s15, %s2021_s16  }
  0x1d   : > { %s36_s26 = ssub.s32 %s1644_s20, %s1775_s22  ;;  %s39_s28 = sadd.s32 1, %s1640_s19 }
  0x1e   : > { %p37_p7 = scmp.eq.s32.totalorder %s36_s26, 0  ;;  %p46_p8 = scmp.ne.s32.totalorder %s1640_s19, %s1636_s18 }
  0x1f   : > { %p47_p9 = scmp.eq.s32.totalorder %s1644_s20, 0  ;;  %p52_p10 = scmp.ne.s32.totalorder %s1636_s18, %s1632_s17 }
  0x20   : > { %s1786_s23 = scalar_select %p37_p7, %s1640_s19, %s39_s28  }
  0x21   : > { %p48_p11 = por %p47_p9, %p46_p8  ;;  %p1790_p12 = por %p2029_p1, %p52_p10 }
  0x22   : > { %2043 = sst [smem:[#allocation27_spill]] %s1786_s23  ;;  %p296_p13 = scmp.eq.s32.totalorder %s1742_s24, 1 }
  0x23   : > { %p302_p0 = scmp.eq.s32.totalorder %s1153_s21, 1  ;;  %p1286_p2 = scmp.lt.s32.totalorder %s1644_s20, 2 }
  0x24   : > { %s2025_s29 = sand.u32 1, %s1640_s19   ;;  %p1797_p4 = por %p296_p13, %p46_p8 }
  0x25   : > { %p1801_p5 = por %p302_p0, %p52_p10  ;;  %s1807_s14 = sshll.u32 %s2025_s29, 2 }
  0x26   : > { %s1810_s26 = sshll.u32 %s1644_s20, 2  ;;  %p1812_p7 = pnand %p1286_p2, %p48_p11 }
  0x27   : > { %s2046_s13 = scalar_select %p1801_p5, 1, 0 }
  0x28   : > { %s409_s21 = sand.u32 1, %s1644_s20   ;;  %s2049_s1 = sld [smem:[#allocation29_spill]] }
  0x29   : > { %2047 = sst [smem:[#allocation28_spill]] %s2046_s13  ;;  %s413_s23 = scalar_lea.vmem [#allocation9], %s1807_s14 }
  0x2a   : > { %s421_s22 = sshll.u32 %s413_s23, 4  ;;  %s1822_s29 = scalar_lea.sflag [#allocation10], %s409_s21  ;;  %s422_s22 = int_to_ptr.vmem [resolvable:$true] %s421_s22 }
  0x2b   : > { %p1420_p9 = pneg %p1812_p7 }
  0x2e   : > { %s417_s3 = scalar_lea.hbm %s2049_s1, %s1810_s26 }
  0x2f   : > { %s419_s7 = sshll.u32 %s417_s3, 4  ;;  %s1423_s3 = scalar_lea.hbm %s2049_s1, 8  ;;  %s420_s7 = int_to_ptr.hbm [resolvable:$true] %s419_s7 }
  0x30   : > { %s1416_s13 = sshra.s32 %s420_s7, 4  ;;  %s1417_s13 = int_to_ptr.hbm [resolvable:$true] %s1416_s13 }
  0x31   : > { %s1418_s17 = scalar_lea.hbm %s1417_s13, 4  ;;  %p1424_p13 = scmp.lt.s32.totalorder %s1417_s13, %s2049_s1 }
  0x32   : > { %p1419_p8 = scmp.ne.s32.totalorder %s1417_s13, %s1418_s17  ;;  %p1425_p0 = scmp.lt.s32.totalorder %s1423_s3, %s1418_s17 }
  0x34   : > { %p1421_p10 = pnand %p1420_p9, %p1419_p8  ;;  %p1426_p2 = por %p1425_p0, %p1424_p13 }
  0x36   : > { %p1422_p11 = pneg %p1421_p10 }
  0x38   : > { %p1427_p1 = pnand %p1426_p2, %p1422_p11 }
  0x3a   : > { %1430 = shalt.err (!%p1427_p1)
}
  0x3b   : > { %1274 = dma.hbm_to_vmem [thread:$0]  (!%p1812_p7), %s420_s7, 64, %s422_s22, %s1822_s29  }
  0x3c   : > { %s2050_s5 = sld [smem:[#allocation31_spill]]  ;;  %s1650_s15 = smov [#allocation14]  }
  0x3d   : > { %s339_s13 = sshll.u32 %s1650_s15, 4  ;;  %s2051_s9 = sld [smem:[#allocation33_spill]]  ;;  %s340_s13 = int_to_ptr.vmem [resolvable:$true] %s339_s13 }
  0x3e   : > { %s2052_s23 = smov 4   ;;  %s2053_s1 = smov 64  }
  0x3f   : > { %s1651_s7 = smov [#allocation17]   ;;  %s398_s15 = scalar_lea.hbm %s2007_s0, %s1810_s26 }
  0x40   : > { %s373_s22 = sshll.u32 %s1651_s7, 4  ;;  %s394_s17 = scalar_lea.vmem [#allocation6], %s1807_s14  ;;  %s374_s22 = int_to_ptr.vmem [resolvable:$true] %s373_s22 }
  0x41   : > { %s402_s3 = sshll.u32 %s394_s17, 4  ;;  %s403_s3 = int_to_ptr.vmem [resolvable:$true] %s402_s3 }
  0x42   : > { %s337_s20 = sshll.u32 %s2050_s5, 4  ;;  %s400_s5 = sshll.u32 %s398_s15, 4  ;;  %s338_s20 = int_to_ptr.hbm [resolvable:$true] %s337_s20  ;;  %s401_s5 = int_to_ptr.hbm [resolvable:$true] %s400_s5 }
  0x43   : > { %s371_s16 = sshll.u32 %s2051_s9, 4  ;;  %s1506_s9 = sshra.s32 %s401_s5, 4  ;;  %s372_s16 = int_to_ptr.hbm [resolvable:$true] %s371_s16  ;;  %s1507_s9 = int_to_ptr.hbm [resolvable:$true] %s1506_s9 }
  0x44   : > { %1261 = dma.hbm_to_vmem [thread:$0]  (!%p1759_p6), %s338_s20, 256, %s340_s13, [#allocation13], %s2053_s1, %s2053_s1, %s2052_s23  }
  0x45   : > { %1267 = dma.hbm_to_vmem [thread:$0]  (!%p1759_p6), %s372_s16, 256, %s374_s22, [#allocation16], %s2053_s1, %s2053_s1, %s2052_s23  }
  0x46   : > { %s2054_s20 = sand.u32 1, %s1640_s19   ;;  %s1508_s7 = scalar_lea.hbm %s1507_s9, 4 }
  0x47   : > { %s391_s13 = scalar_lea.sflag [#allocation7], %s2054_s20  ;;  %p1509_p1 = scmp.ne.s32.totalorder %s1507_s9, %s1508_s7 }
  0x48   : > { %s1513_s16 = scalar_lea.hbm %s2007_s0, 8  ;;  %p1514_p6 = scmp.lt.s32.totalorder %s1507_s9, %s2007_s0 }
  0x49   : > { %p1511_p8 = pnand %p1509_p1, %p1420_p9  ;;  %p1515_p11 = scmp.lt.s32.totalorder %s1513_s16, %s1508_s7 }
  0x4b   : > { %p1512_p10 = pneg %p1511_p8  ;;  %p1516_p13 = por %p1515_p11, %p1514_p6 }
  0x4d   : > { %p1517_p0 = pnand %p1516_p13, %p1512_p10 }
  0x4f   : > { %1520 = shalt.err (!%p1517_p0)
}
  0x50   : > { %1271 = dma.hbm_to_vmem [thread:$0]  (!%p1812_p7), %s401_s5, 64, %s403_s3, %s391_s13  }
  0x51   : > { %s436_s15 = scalar_lea.hbm %s2009_s2, %s1810_s26  ;;  %s432_s17 = scalar_lea.vmem [#allocation11], %s1807_s14 }
  0x52   : > { %s440_s20 = sshll.u32 %s432_s17, 4  ;;  %s438_s1 = sshll.u32 %s436_s15, 4  ;;  %s441_s20 = int_to_ptr.vmem [resolvable:$true] %s440_s20  ;;  %s439_s1 = int_to_ptr.hbm [resolvable:$true] %s438_s1 }
  0x53   : > { %s1536_s9 = sshra.s32 %s439_s1, 4  ;;  %s1543_s5 = scalar_lea.hbm %s2009_s2, 8  ;;  %s1537_s9 = int_to_ptr.hbm [resolvable:$true] %s1536_s9 }
  0x54   : > { %s1538_s7 = scalar_lea.hbm %s1537_s9, 4  ;;  %p1544_p10 = scmp.lt.s32.totalorder %s1537_s9, %s2009_s2 }
  0x55   : > { %p1539_p2 = scmp.ne.s32.totalorder %s1537_s9, %s1538_s7  ;;  %p1545_p6 = scmp.lt.s32.totalorder %s1543_s5, %s1538_s7 }
  0x57   : > { %p1541_p1 = pnand %p1539_p2, %p1420_p9  ;;  %p1546_p11 = por %p1545_p6, %p1544_p10 }
  0x59   : > { %p1542_p8 = pneg %p1541_p1 }
  0x5b   : > { %p1547_p13 = pnand %p1546_p11, %p1542_p8 }
  0x5d   : > { %1550 = shalt.err (!%p1547_p13)
}
  0x5e   : > { %1277 = dma.hbm_to_vmem [thread:$0]  (!%p1812_p7), %s439_s1, 64, %s441_s20, %s1822_s29  }
  0x5f   : > { %449 = sbr.rel (%p1747_p3) target bundleno = 1201 (0x4b1), region = 64  ;;  %s1892_s14 = sand.u32 (!%p1747_p3), 1, %s1636_s18  }
  0x60   : > { %s1895_s26 = sshll.u32 (!%p1747_p3), %s1892_s14, 2  ;;  %s452_s23 = scalar_lea.sflag (!%p1747_p3), [#allocation7], %s1892_s14 }
  0x61   : > { %s455_s22 = scalar_lea.vmem (!%p1747_p3), [#allocation6], %s1895_s26 }
  0x64   : > { %1611 = dma.done.wait (%p1790_p12), %s452_s23, 64  }
  0x65   : > { %1613 = vsyncadd (%p1790_p12), %s452_s23, 4294967232  ;;  %s461_s25 = sand.u32 1, %s1742_s24   ;;  %s465_s28 = scalar_lea.vmem [#allocation9], %s1895_s26 }
  0x66   : > { %s462_s29 = scalar_lea.sflag [#allocation10], %s461_s25 }
  0x67   : > { %1615 = dma.done.wait (%p1790_p12), %s462_s29, 128  }
  0x68   : > { %1617 = vsyncadd (%p1790_p12), %s462_s29, 4294967168  ;;  %s475_s10 = scalar_lea.vmem [#allocation11], %s1895_s26  ;;  %p2055_p3 = scmp.eq.s32.totalorder %s1742_s24, 0 }
  0x6a   : > { %1619 = dma.done.wait (%p2055_p3), [#allocation13], 512   ;;  %p2056_p7 = pmov %p2055_p3 }
  0x6b   : > { %p2057_p9 = pmov %p2055_p3 }
  0x6c   : > { %1621 = vsyncadd (%p2056_p7), [#allocation13], 4294966784 }
  0x6d   : > { %1623 = dma.done.wait (%p2057_p9), [#allocation16], 512   ;;  %p2058_p0 = pmov %p2055_p3 }
  0x6e   : > { %v1224_v0 = vld [vmem:[#allocation12 + $0x8] sm:$0xff]  ;;  %v1226_v1 = vld [vmem:[#allocation14 + $0x8] sm:$0xff]  ;;  %v1223_v2 = vld [vmem:[#allocation12] sm:$0xff]  ;;  %vm569_vm0 = vcmask 261120   ;;  %vm587_vm1 = vcmask 257024   ;;  %vm668_vm2 = vcmask 64512  }
  0x6f   : > { %1625 = vsyncadd (%p2058_p0), [#allocation16], 4294966784  ;;  %579 = vmatpush.bf16.msra.mxu0 %v1224_v0  ;;  %618 = vmatpush.bf16.msra.mxu1 %v1226_v1  ;;  %v1225_v3 = vld [vmem:[#allocation14] sm:$0xff]  ;;  %v546_v4 = vld [vmem:[%s455_s22] sm:$0xf]  ;;  %s1652_s20 = smov 112  }
  0x70   : > { %v547_v5 = vld [vmem:[%s465_s28] sm:$0xf]  ;;  %v1336_v6 = vld [vmem:[%s2011_s4] ss:$0 sm:$0xff]  ;;  %s1653_s1 = smov 120   ;;  %s1654_s9 = smov 104  }
  0x71   : > { %v1337_v7 = vld [vmem:[%s2013_s6] ss:$0 sm:$0xff]  ;;  %v1228_v37 = vld [vmem:[#allocation15 + $0x8] sm:$0xff]  ;;  %v1227_v38 = vld [vmem:[#allocation15] sm:$0xff]  ;;  %vm703_vm3 = vcmask 1043456   ;;  %vm721_vm4 = vcmask 60416  }
  0x72   : > { %656 = vmatpush.bf16.msra.mxu2 %v1228_v37  ;;  %v548_v43 = vld [vmem:[%s475_s10] sm:$0xf]  ;;  %s1655_s16 = smov 8   ;;  %s1656_s5 = smov 24   ;;  %vm796_vm5 = vcmask 126016   ;;  %vm871_vm6 = vcmask 191616  }
  0x73   : > { %580 = vmatpush.bf16.msra.mxu0 %v1223_v2  ;;  %619 = vmatpush.bf16.msra.mxu1 %v1225_v3  ;;  %v1338_v2 = vld [vmem:[%s2015_s8] ss:$0 sm:$0xff]  ;;  %s1657_s3 = smov 16   ;;  %vm946_vm7 = vcmask 257216   ;;  %s1220_s13 = sshll.u32 %s1742_s24, 3 }
  0x74   : > { %s1174_s26 = sshll.u32 %s1892_s14, 3  ;;  %s997_s25 = scalar_lea.hbm %s2018_s11, %s1220_s13 }
  0x75   : > { %s2059_s10 = sld [smem:[#allocation34_spill]]  ;;  %s544_s27 = scalar_lea.vmem [#allocation18], %s1174_s26 }
  0x76   : > { %1183 = vmatmul.msk.bf16.vlgmr.msra.gmra.mxu0 %vm569_vm0, %v546_v4  ;;  %1192 = vmatmul.msk.bf16.vlgmr.msra.gmra.mxu1 %vm569_vm0, %v547_v5  ;;  %s999_s21 = sshll.u32 %s544_s27, 4  ;;  %s1001_s15 = sshll.u32 %s997_s25, 4  ;;  %s1000_s21 = int_to_ptr.vmem [resolvable:$true] %s999_s21  ;;  %s1002_s15 = int_to_ptr.hbm [resolvable:$true] %s1001_s15 }
  0x77   : > { %657 = vmatpush.bf16.msra.mxu2 %v1227_v38  ;;  %s987_s24 = scalar_lea.sflag [#allocation8], %s1892_s14  ;;  %s1580_s17 = sshra.s32 %s1002_s15, 4  ;;  %s1581_s17 = int_to_ptr.hbm [resolvable:$true] %s1580_s17 }
  0x78   : > { %s1586_s7 = scalar_lea.hbm %s2018_s11, 16  ;;  %p1587_p8 = scmp.lt.s32.totalorder %s1581_s17, %s2018_s11 }
  0x7a   : > { %1201 = vmatmul.msk.bf16.vlgmr.msra.gmra.mxu2 %vm569_vm0, %v548_v43 }
  0xf3   : > { %v582_v8 = vpop.f32.mrf.mxu0  ;;  %v621_v9 = vpop.f32.mrf.mxu1 }
  0xf4   : > { %v583_v10 = vadd.f32 %v1336_v6, %v582_v8  ;;  %v622_v11 = vadd.f32 %v1337_v7, %v621_v9 }
  0xf6   : > { %v586_v12 = vpack.c.bf16 %v583_v10, %v583_v10  ;;  %v625_v13 = vpack.c.bf16 %v622_v11, %v622_v11 }
  0xf8   : > { %588 = vst.msk [vmem:[#allocation2] sm:$0xf] %vm587_vm1, %v586_v12 }
  0xf9   : > { %626 = vst.msk [vmem:[#allocation3] sm:$0xf] %vm587_vm1, %v625_v13 }
  0xfb   : > { %v584_v14 = vpop.f32.mrf.mxu0  ;;  %v623_v15 = vpop.f32.mrf.mxu1 }
  0xfd   : > { %v659_v3 = vpop.f32.mrf.mxu2 }
  0xfe   : > { %v660_v4 = vadd.f32 %v1338_v2, %v659_v3 }
  0xff   : > { %v798_v16 = vld [vmem:[#allocation2] sm:$0xf] }
 0x100   : > { %v666_v17 = vld [vmem:[#allocation3] sm:$0xf]  ;;  %v802_v20 = vunpack.c.l.b16 %v798_v16  ;;  %v873_v24 = vld [vmem:[#allocation2] sm:$0xf]  ;;  %v663_v5 = vpack.c.bf16 %v660_v4, %v660_v4 }
 0x101   : > { %v799_v18 = vld [vmem:[#allocation3] sm:$0xf]  ;;  %v673_v21 = vsel %vm668_vm2, %v666_v17, 0  ;;  %v723_v26 = vld [vmem:[#allocation2] sm:$0xf]  ;;  %v877_v30 = vunpack.c.l.b16 %v873_v24 }
 0x102   : > { %v724_v19 = vld [vmem:[#allocation3] sm:$0xf]  ;;  %v807_v22 = vunpack.c.l.b16 %v799_v18  ;;  %682 = vmatpush.bf16.xpose.msra.mxu3 %v673_v21  ;;  %v803_v25 = vpack.c.b16 %v802_v20, %v802_v20  ;;  %v727_v31 = vunpack.c.l.b16 %v723_v26  ;;  %v665_v32 = vld [vmem:[#allocation2] sm:$0xf]  ;;  %664 = vst.msk [vmem:[#allocation4] sm:$0xf] %vm587_vm1, %v663_v5 }
 0x103   : > { %v732_v23 = vunpack.c.l.b16 %v724_v19  ;;  %v874_v29 = vld [vmem:[#allocation3] sm:$0xf]  ;;  %v878_v34 = vpack.c.b16 %v877_v30, %v877_v30  ;;  %v1229_v5 = vld [vmem:[#allocation17] sm:$0xff] }
 0x104   : > { %v808_v27 = vpack.c.b16 %v807_v22, %v807_v22  ;;  %804 = vrot.lane.b32.xlu2 %v803_v25, %s1652_s20  ;;  %v882_v33 = vunpack.c.l.b16 %v874_v29  ;;  %v728_v35 = vpack.c.b16 %v727_v31, %v727_v31  ;;  %v1230_v4 = vld [vmem:[#allocation17 + $0x8] sm:$0xff] }
 0x105   : > { %v733_v28 = vpack.c.b16 %v732_v23, %v732_v23  ;;  %v661_v6 = vpop.f32.mrf.mxu2 }
 0x106   : > { %809 = vrot.lane.b32.xlu1 %v808_v27, %s1652_s20  ;;  %v883_v36 = vpack.c.b16 %v882_v33, %v882_v33 }
 0x107   : > { %734 = vrot.lane.b32.xlu0 %v733_v28, %s1653_s1 }
 0x109   : > { %1202 = vmatmul.msk.bf16.vlgmr.msra.gmra.mxu3 %vm668_vm2, %v665_v32  ;;  %v667_v7 = vld [vmem:[#allocation4] sm:$0xf] }
 0x10a   : > { %v705_v8 = vsel %vm703_vm3, %v667_v7, 0  ;;  %v725_v12 = vld [vmem:[#allocation4] sm:$0xf] }
 0x10b   : > { %714 = vmatpush.bf16.msrb.mxu0 %v705_v8  ;;  %v768_v13 = vunpack.c.l.b16 %v725_v12  ;;  %v875_v31 = vld [vmem:[#allocation4] sm:$0xf] }
 0x10c   : > { %879 = vrot.lane.b32.xlu2 %v878_v34, %s1654_s9  ;;  %v918_v32 = vunpack.c.l.b16 %v875_v31  ;;  %v800_v34 = vld [vmem:[#allocation4] sm:$0xf] }
 0x10d   : > { %v769_v14 = vpack.c.b16 %v768_v13, %v768_v13 }
 0x10e   : > { %884 = vrot.lane.b32.xlu1 %v883_v36, %s1654_s9  ;;  %v919_v33 = vpack.c.b16 %v918_v32, %v918_v32 }
 0x10f   : > { %729 = vrot.lane.b32.xlu0 %v728_v35, %s1653_s1  ;;  %v843_v35 = vunpack.c.l.b16 %v800_v34 }
 0x111   : > { %v844_v36 = vpack.c.b16 %v843_v35, %v843_v35 }
 0x15e   : > { %v805_v44 = vpop.permute.xlu2 %804 }
 0x166   : > { %v880_v50 = vpop.permute.xlu2 %879 }
 0x178   : > { %v810_v39 = vpop.permute.xlu1 %809 }
 0x179   : > { %v735_v40 = vpop.permute.xlu0 %734  ;;  %v815_v42 = vsel %vm668_vm2, %v810_v39, 0 }
 0x17a   : > { %v740_v41 = vsel %vm668_vm2, %v735_v40, 0  ;;  %824 = vmatpush.bf16.xpose.msrb.mxu3 %v815_v42 }
 0x17b   : > { %749 = vmatpush.bf16.xpose.msrb.mxu1 %v740_v41 }
 0x180   : > { %v885_v45 = vpop.permute.xlu1 %884 }
 0x181   : > { %v730_v46 = vpop.permute.xlu0 %729  ;;  %v890_v47 = vsel %vm668_vm2, %v885_v45, 0  ;;  %1206 = vmatmul.msk.bf16.vlgmr.msrb.gmra.mxu3 %vm668_vm2, %v805_v44 }
 0x182   : > { %1204 = vmatmul.msk.bf16.vlgmr.msrb.gmra.mxu1 %vm668_vm2, %v730_v46  ;;  %978 = vmatpush.bf16.msra.mxu3 %v1230_v4 }
 0x183   : > { %899 = vmatpush.bf16.xpose.msra.mxu1 %v890_v47 }
 0x186   : > { %979 = vmatpush.bf16.msra.mxu3 %v1229_v5 }
 0x18c   : > { %v684_v48 = vpop.f32.mrf.mxu3 }
 0x18d   : > { %v688_v49 = vsel %vm668_vm2, %v684_v48, -inf }
 0x18e   : > { %689 = vmax.xlane.f32.xlu1 %v688_v49 }
 0x192   : > { %1208 = vmatmul.msk.bf16.vlgmr.msra.gmra.mxu1 %vm668_vm2, %v880_v50 }
 0x194   : > { %v686_v51 = vpop.f32.mrf.mxu3 }
 0x1ff   : > { %v751_v52 = vpop.f32.mrf.mxu1 }
 0x200   : > { %v755_v53 = vsel %vm668_vm2, %v751_v52, -inf }
 0x201   : > { %756 = vmax.xlane.f32.xlu0 %v755_v53  ;;  %v690_v54 = vpop.xlane.xlu1 %689 }
 0x202   : > { %v691_v55 = vsub.f32 %v684_v48, %v690_v54 }
 0x204   : > { %v826_v56 = vpop.f32.mrf.mxu3  ;;  %v692_v57 = vmul.f32 1.442695, %v691_v55 }
 0x205   : > { %v830_v1 = vsel %vm668_vm2, %v826_v56, -inf }
 0x206   : > { %1340 = vpow2.f32 %v692_v57 }
 0x207   : > { %v753_v58 = vpop.f32.mrf.mxu1 }
 0x20c   : > { %v828_v59 = vpop.f32.mrf.mxu3  ;;  %v1341_v60 = vpop.eup %1340 }
 0x20d   : > { %v694_v62 = vsel %vm668_vm2, %v1341_v60, 0.0 }
 0x20e   : > { %695 = vadd.xlane.f32.xlu1 %v694_v62 }
 0x20f   : > { %v901_v61 = vpop.f32.mrf.mxu1 }
 0x210   : > { %v905_v63 = vsel %vm668_vm2, %v901_v61, -inf }
 0x211   : > { %906 = vmax.xlane.f32.xlu2 %v905_v63 }
 0x217   : > { %v903_v0 = vpop.f32.mrf.mxu1 }
 0x219   : > { %831 = vmax.xlane.f32.xlu2 %v830_v1 }
 0x231   : > { %770 = vrot.lane.b32.xlu2 %v769_v14, %s1653_s1 }
 0x274   : > { %v757_v9 = vpop.xlane.xlu0 %756 }
 0x275   : > { %v758_v10 = vsub.f32 %v751_v52, %v757_v9  ;;  %v1339_v9 = vld [vmem:[%s2059_s10] ss:$0 sm:$0xff] }
 0x277   : > { %v759_v11 = vmul.f32 1.442695, %v758_v10 }
 0x279   : > { %1342 = vpow2.f32 %v759_v11 }
 0x27f   : > { %v1343_v15 = vpop.eup %1342 }
 0x280   : > { %v761_v16 = vsel %vm668_vm2, %v1343_v15, 0.0 }
 0x281   : > { %762 = vadd.xlane.f32.xlu0 %v761_v16  ;;  %v696_v17 = vpop.xlane.xlu1 %695 }
 0x282   : > { %1344 = vrcp.f32 %v696_v17 }
 0x284   : > { %v907_v18 = vpop.xlane.xlu2 %906 }
 0x285   : > { %v908_v19 = vsub.f32 %v901_v61, %v907_v18 }
 0x287   : > { %v909_v20 = vmul.f32 1.442695, %v908_v19 }
 0x288   : > { %v1345_v21 = vpop.eup %1344 }
 0x289   : > { %1346 = vpow2.f32 %v909_v20  ;;  %v698_v22 = vmul.f32 %v1345_v21, %v1341_v60 }
 0x28b   : > { %v699_v25 = vpack.c.bf16 %v698_v22, %v698_v22 }
 0x28c   : > { %v832_v23 = vpop.xlane.xlu2 %831 }
 0x28d   : > { %v833_v24 = vsub.f32 %v826_v56, %v832_v23  ;;  %1203 = vmatmul.msk.bf16.vlgmr.msrb.gmra.mxu0 %vm668_vm2, %v699_v25 }
 0x28f   : > { %v1347_v26 = vpop.eup %1346  ;;  %v834_v27 = vmul.f32 1.442695, %v833_v24 }
 0x290   : > { %v911_v28 = vsel %vm668_vm2, %v1347_v26, 0.0 }
 0x291   : > { %1348 = vpow2.f32 %v834_v27  ;;  %912 = vadd.xlane.f32.xlu0 %v911_v28 }
 0x294   : > { %v771_v37 = vpop.permute.xlu2 %770 }
 0x295   : > { %v776_v38 = vsel %vm703_vm3, %v771_v37, 0 }
 0x296   : > { %785 = vmatpush.bf16.msrb.mxu2 %v776_v38 }
 0x297   : > { %v1349_v29 = vpop.eup %1348 }
 0x298   : > { %v836_v30 = vsel %vm668_vm2, %v1349_v29, 0.0 }
 0x299   : > { %837 = vadd.xlane.f32.xlu1 %v836_v30 }
 0x2a5   : > { %920 = vrot.lane.b32.xlu0 %v919_v33, %s1654_s9 }
 0x2b2   : > { %845 = vrot.lane.b32.xlu1 %v844_v36, %s1652_s20  ;;  %s1582_s20 = scalar_lea.hbm %s1581_s17, 8 }
 0x2b3   : > { %p1583_p12 = scmp.ne.s32.totalorder %s1581_s17, %s1582_s20  ;;  %p1588_p10 = scmp.lt.s32.totalorder %s1586_s7, %s1582_s20 }
 0x2b5   : > { %p1584_p2 = pnand %p1583_p12, %p1797_p4  ;;  %p1589_p6 = por %p1588_p10, %p1587_p8 }
 0x2b7   : > { %p1585_p1 = pneg %p1584_p2 }
 0x2b9   : > { %p1590_p11 = pnand %p1589_p6, %p1585_p1 }
 0x2f4   : > { %v763_v39 = vpop.xlane.xlu0 %762 }
 0x2f5   : > { %1350 = vrcp.f32 %v763_v39 }
 0x2fb   : > { %v1351_v40 = vpop.eup %1350 }
 0x2fc   : > { %v765_v41 = vmul.f32 %v1351_v40, %v1343_v15 }
 0x2fe   : > { %v766_v42 = vpack.c.bf16 %v765_v41, %v765_v41 }
 0x300   : > { %1205 = vmatmul.msk.bf16.vlgmr.msrb.gmra.mxu2 %vm668_vm2, %v766_v42 }
 0x304   : > { %v913_v43 = vpop.xlane.xlu0 %912 }
 0x305   : > { %1352 = vrcp.f32 %v913_v43 }
 0x30a   : > { %v716_v44 = vpop.f32.mrf.mxu0 }
 0x30b   : > { %v720_v45 = vpack.c.bf16 %v716_v44, %v716_v44  ;;  %v1353_v46 = vpop.eup %1352 }
 0x30c   : > { %v915_v48 = vmul.f32 %v1353_v46, %v1347_v26  ;;  %v838_v49 = vpop.xlane.xlu1 %837 }
 0x30d   : > { %722 = vst.msk [vmem:[#allocation5] sm:$0xf] %vm721_vm4, %v720_v45  ;;  %1354 = vrcp.f32 %v838_v49 }
 0x30e   : > { %v916_v52 = vpack.c.bf16 %v915_v48, %v915_v48 }
 0x312   : > { %v718_v47 = vpop.f32.mrf.mxu0 }
 0x313   : > { %v1355_v53 = vpop.eup %1354 }
 0x314   : > { %v840_v54 = vmul.f32 %v1355_v53, %v1349_v29 }
 0x316   : > { %v841_v57 = vpack.c.bf16 %v840_v54, %v840_v54 }
 0x317   : > { %v921_v50 = vpop.permute.xlu0 %920 }
 0x318   : > { %v926_v51 = vsel %vm703_vm3, %v921_v50, 0 }
 0x319   : > { %935 = vmatpush.bf16.msra.mxu2 %v926_v51 }
 0x31c   : > { %1209 = vmatmul.msk.bf16.vlgmr.msra.gmra.mxu2 %vm668_vm2, %v916_v52 }
 0x324   : > { %v846_v55 = vpop.permute.xlu1 %845 }
 0x325   : > { %v851_v56 = vsel %vm703_vm3, %v846_v55, 0 }
 0x326   : > { %860 = vmatpush.bf16.msra.mxu0 %v851_v56 }
 0x329   : > { %1207 = vmatmul.msk.bf16.vlgmr.msra.gmra.mxu0 %vm668_vm2, %v841_v57 }
 0x383   : > { %v787_v58 = vpop.f32.mrf.mxu2 }
 0x384   : > { %v791_v59 = vpack.c.bf16 %v787_v58, %v787_v58 }
 0x386   : > { %793 = vrot.lane.b32.xlu2 %v791_v59, %s1655_s16 }
 0x38b   : > { %v789_v60 = vpop.f32.mrf.mxu2 }
 0x39f   : > { %v937_v61 = vpop.f32.mrf.mxu2 }
 0x3a0   : > { %v941_v62 = vpack.c.bf16 %v937_v61, %v937_v61 }
 0x3a2   : > { %943 = vrot.lane.b32.xlu2 %v941_v62, %s1656_s5 }
 0x3a6   : > { %v862_v63 = vpop.f32.mrf.mxu0 }
 0x3a7   : > { %v866_v0 = vpack.c.bf16 %v862_v63, %v862_v63  ;;  %v939_v1 = vpop.f32.mrf.mxu2 }
 0x3a9   : > { %868 = vrot.lane.b32.xlu0 %v866_v0, %s1657_s3 }
 0x3ae   : > { %v864_v2 = vpop.f32.mrf.mxu0 }
 0x3e0   : > { %v794_v3 = vpop.permute.xlu2 %793 }
 0x3e1   : > { %797 = vst.msk [vmem:[#allocation5] sm:$0xf] %vm796_vm5, %v794_v3 }
 0x3fc   : > { %v944_v7 = vpop.permute.xlu2 %943 }
 0x41b   : > { %v869_v6 = vpop.permute.xlu0 %868 }
 0x41c   : > { %872 = vst.msk [vmem:[#allocation5] sm:$0xf] %vm871_vm6, %v869_v6 }
 0x41d   : > { %947 = vst.msk [vmem:[#allocation5] sm:$0xf] %vm946_vm7, %v944_v7 }
 0x424   : > { %v948_v8 = vld [vmem:[#allocation5] sm:$0xf] }
 0x425   : > { %1218 = vmatmul.msk.bf16.vlgmr.msra.gmra.mxu3 %vm569_vm0, %v948_v8 }
 0x4a8   : > { %v981_v10 = vpop.f32.mrf.mxu3 }
 0x4a9   : > { %v982_v11 = vadd.f32 %v1339_v9, %v981_v10 }
 0x4ab   : > { %985 = vst.msk [vmem:[%s544_s27] sm:$0xff] %vm569_vm0, %v982_v11 }
 0x4ac   : > { %1593 = shalt.err (!%p1590_p11)
}
 0x4ad   : > { %1253 = dma.vmem_to_hbm [thread:$0]  (%p1797_p4), %s1000_s21, 128, %s1002_s15, %s987_s24  }
 0x4b0   : > { %v983_v12 = vpop.f32.mrf.mxu3 }
 0x4b1 PF: > { %s2060_s14 = sld [smem:[#allocation24_spill]] }
 0x4b2   : > { %s2062_s3 = sld [smem:[#allocation25_spill]] }
 0x4b7   : > { %s1013_s13 = sand.u32 1, %s2060_s14  }
 0x4b8   : > { %p2063_p13 = scmp.ge.s32.totalorder %s2062_s3, 2  ;;  %s1014_s26 = scalar_lea.sflag [#allocation8], %s1013_s13 }
 0x4ba   : > { %p1279_p3 = pnand %p2063_p13, %p1801_p5 }
 0x4bc   : > { %p1280_p7 = pneg %p1279_p3 }
 0x4be   : > { %1627 = dma.done.wait (%p1280_p7), %s1014_s26, 128  }
 0x4bf   : > { %1629 = vsyncadd (%p1280_p7), %s1014_s26, 4294967168  ;;  %s2064_s20 = sld [smem:[#allocation26_spill]]  ;;  %s2066_s17 = smov %s1636_s18 }
 0x4c0   : > { %s2065_s23 = sld [smem:[#allocation27_spill]]  ;;  %s2067_s18 = smov %s1640_s19 }
 0x4c5   : > { %p29_p9 = scmp.ge.s32.totalorder %s2064_s20, 4  }
 0x4c6   : > { %s2068_s19 = smov %s2065_s23 }
 0x4c7   :  { %31 = sbr.rel (!%p29_p9) target bundleno = 16 (0x10), region = 149 }
 0x4cc   :  { %1020 = vsyncpa [#allocation7], 1 }
 0x4cd   :  { %1022 = vsyncpa [#allocation7 + $0x1], 1 }
 0x4ce   :  { %1023 = vsyncpa [#allocation10], 1 }
 0x4cf   :  { %1025 = vsyncpa [#allocation10 + $0x1], 1 }
 0x4d0   :  { %1026 = vsyncpa [#allocation13], 1 }
 0x4d1   :  { %1027 = vsyncpa [#allocation16], 1 }
 0x4d2   :  { %1028 = vsyncpa [#allocation8], 1 }
 0x4d3   :  { %1030 = vsyncpa [#allocation8 + $0x1], 1 }

</bundles_post_ra>
